<compile_context>
chip_gen: v7x
topology: tpu7x:2x2x1
jax: 0.10.0
libtpu: 0.0.40
codegen_flags: <defaults>
</compile_context>

<pallas_src>
import functools

import jax
import jax.numpy as jnp
from jax.experimental import pallas as pl
from jax.experimental.pallas import tpu as pltpu


def _fair_partials_kernel(*refs, col_up, col_pr, col_des, two_windows,
                          lane_w, tiles_per_chunk, tile_n, n_rows):
    """Accumulates three (1, lane_w) column-sum vectors per chunk:
       row 0: sum over rows of x            -> lanes col_up / col_pr give the
                                               two column sums.
       row 1: sum over rows of x * roll_up  -> lane col_up gives
                                               sum(x[:,S+up]   * x[:,Y+des]).
       row 2: sum over rows of x * roll_pr  -> lane col_pr gives
                                               sum(x[:,S+priv] * x[:,Y+des]).
    """
    if two_windows:
        xs_ref, xy_ref, part_ref = refs       # S window, Y window, partials
    else:
        xs_ref, part_ref = refs
        xy_ref = None

    c = pl.program_id(0)                      # chunk (parallel; v7x megacore)
    t = pl.program_id(1)                      # row tile within chunk (reduce)

    @pl.when(t == 0)
    def _init():
        part_ref[...] = jnp.zeros_like(part_ref)

    xs = xs_ref[...].astype(jnp.float32)      # (tile_n, lane_w) S window
    xy = xs if xy_ref is None else xy_ref[...].astype(jnp.float32)

    base = (c * tiles_per_chunk + t) * tile_n  # first (unclamped) row of tile

    def _sums(xs_t, xy_t):
        # One sublane-direction (axis=0) sum for the plain column sums.
        cs_x = jnp.sum(xs_t, axis=0, keepdims=True)             # (1, lane_w)
        if lane_w % 128 == 0:
            # XLU lane-rotations align the desire column onto the S lanes;
            # the VPU only does 2 multiplies + 2 axis-0 sums on top.
            r_up = pltpu.roll(xy_t, shift=(col_up - col_des) % lane_w, axis=1)
            r_pr = pltpu.roll(xy_t, shift=(col_pr - col_des) % lane_w, axis=1)
            cs_up = jnp.sum(xs_t * r_up, axis=0, keepdims=True)
            cs_pr = jnp.sum(xs_t * r_pr, axis=0, keepdims=True)
        else:
            # Narrow (D < 128) / unaligned window: extract the desire column
            # once and lane-broadcast it into a single product.
            col = jax.lax.broadcasted_iota(jnp.int32, xy_t.shape, 1)
            i_des = jnp.sum(jnp.where(col == col_des, xy_t, 0.0),
                            axis=1, keepdims=True)              # (tile_n, 1)
            cs_up = jnp.sum(xs_t * i_des, axis=0, keepdims=True)
            cs_pr = cs_up
        return cs_x, cs_up, cs_pr

    def _fast():                               # interior tiles: no masking
        return _sums(xs, xy)

    def _masked():                             # ragged / clamped-OOB tiles
        row = jax.lax.broadcasted_iota(jnp.int32, xs.shape, 0) + base
        valid = row < n_rows
        xs_m = jnp.where(valid, xs, 0.0)
        # Mask the Y window too (its padded rows are unspecified and could be
        # non-finite; 0 * NaN would otherwise poison the product sums).
        xy_m = xs_m if xy_ref is None else jnp.where(valid, xy, 0.0)
        return _sums(xs_m, xy_m)

    cs_x, cs_up, cs_pr = jax.lax.cond(base + tile_n <= n_rows, _fast, _masked)

    # Accumulate into the revisited (8, lane_w) per-chunk block (VMEM-resident
    # across t; written back to HBM only when the chunk changes).
    part_ref[pl.ds(0, 1), :] = part_ref[pl.ds(0, 1), :] + cs_x
    part_ref[pl.ds(1, 1), :] = part_ref[pl.ds(1, 1), :] + cs_up
    part_ref[pl.ds(2, 1), :] = part_ref[pl.ds(2, 1), :] + cs_pr


def fair_loss_func(x, crit_fake_pred, lamda, *,
                   S_start_index, Y_start_index,
                   underpriv_index, priv_index,
                   undesire_index, desire_index,
                   tile_n=None):
    """Pallas implementation of FairLossFunc.forward. Returns a () f32 scalar.

    x / crit_fake_pred may be bf16 (halves HBM traffic); math is done in f32.
    """
    del undesire_index  # unused by the reference forward pass
    n_rows, d = x.shape

    col_up = S_start_index + underpriv_index
    col_pr = S_start_index + priv_index
    col_des = Y_start_index + desire_index

    # ---- column window(s): DMA only the 128-lane block(s) holding S / Y -----
    if d <= 128 or (col_up // 128) != (col_pr // 128):
        # Narrow input, or the S one-hot pair straddles a 128-lane boundary:
        # fall back to full-width rows (rare; keeps correctness simple).
        lane_w = d
        s_blk = y_blk = 0
        l_up, l_pr, l_des = col_up, col_pr, col_des
        two_windows = False
    else:
        lane_w = 128
        s_blk = col_up // 128
        y_blk = col_des // 128
        l_up, l_pr, l_des = col_up % 128, col_pr % 128, col_des % 128
        two_windows = (y_blk != s_blk)   # separate 128-wide window for Y

    # ---- row tiling: big tiles amortize the ~0.35us/step grid overhead ------
    if tile_n is None:
        # Size for ~12 MiB of triple-buffered f32 input tiles (fits the default
        # scoped-VMEM limit on v5e/v6e/v7x), capped at 8192 rows.
        row_bytes = 4 * 3 * (lane_w + (128 if two_windows else 0))
        tile_n = min(8192, max(8, ((12 * 1024 * 1024) // row_bytes) // 8 * 8))
    tile_n = max(8, (int(tile_n) // 8) * 8)
    tile_n = min(tile_n, -(-n_rows // 8) * 8)
    total_tiles = -(-n_rows // tile_n)
    # Always split across 2 chunks (one per v7x TensorCore) when there is more
    # than one tile; odd tile counts get a clamped, fully-masked extra step.
    n_chunks = 2 if total_tiles >= 2 else 1
    tiles_per_chunk = -(-total_tiles // n_chunks)
    max_blk = total_tiles - 1

    kernel = functools.partial(
        _fair_partials_kernel,
        col_up=l_up, col_pr=l_pr, col_des=l_des,
        two_windows=two_windows, lane_w=lane_w,
        tiles_per_chunk=tiles_per_chunk, tile_n=tile_n, n_rows=n_rows)

    def row_idx(c, t):
        # Clamp out-of-range steps onto the last block; the kernel masks them.
        return jnp.minimum(c * tiles_per_chunk + t, max_blk)

    def make_in_specs(buffered):
        kw = {"pipeline_mode": pl.Buffered(3)} if buffered else {}
        specs = [pl.BlockSpec((tile_n, lane_w),
                              lambda c, t: (row_idx(c, t), s_blk), **kw)]
        operands = [x]
        if two_windows:
            specs.append(pl.BlockSpec((tile_n, 128),
                                      lambda c, t: (row_idx(c, t), y_blk), **kw))
            operands.append(x)
        return specs, operands

    def run(buffered):
        in_specs, operands = make_in_specs(buffered)
        return pl.pallas_call(
            kernel,
            out_shape=jax.ShapeDtypeStruct((n_chunks * 8, lane_w), jnp.float32),
            grid=(n_chunks, tiles_per_chunk),
            in_specs=in_specs,
            # One (8, lane_w) partial block per chunk; constant across t so it
            # stays VMEM-resident and is only written back per chunk.
            out_specs=pl.BlockSpec((8, lane_w), lambda c, t: (c, 0)),
            compiler_params=pltpu.CompilerParams(
                dimension_semantics=("parallel", "arbitrary"),
                vmem_limit_bytes=32 * 1024 * 1024),
        )(*operands)

    try:
        partials = run(buffered=hasattr(pl, "Buffered"))
    except Exception:
        # pipeline_mode / Buffered(3) not supported by this jax/Mosaic build:
        # fall back to the default depth-2 pipeline (correctness unchanged).
        partials = run(buffered=False)

    # ---- tiny final combine (~10 flops) done in the wrapper ------------------
    p = jnp.sum(partials.reshape(n_chunks, 8, lane_w), axis=0)
    sum_up, sum_pr = p[0, l_up], p[0, l_pr]
    sum_upd, sum_prd = p[1, l_up], p[2, l_pr]

    inv_n = 1.0 / float(n_rows)
    mean_crit = jnp.mean(crit_fake_pred.astype(jnp.float32))
    disp = (-1.0 * lamda * (sum_upd * inv_n / sum_up - sum_prd * inv_n / sum_pr)
            - 1.0 * mean_crit)
    return disp


def _reference(x, crit_fake_pred, lamda, S, Y, up, pr, des):
    G = x[:, S:S + 2]
    I = x[:, Y:Y + 2]
    return (-1.0 * lamda
            * (jnp.mean(G[:, up] * I[:, des]) / jnp.sum(x[:, S + up])
               - jnp.mean(G[:, pr] * I[:, des]) / jnp.sum(x[:, S + pr]))
            - 1.0 * jnp.mean(crit_fake_pred))


if __name__ == "__main__":
    def run_case(key, n, d, s_idx, y_idx, up, pr, und, des, tile_n):
        kx, kc = jax.random.split(key)
        # Positive values keep the column sums safely nonzero (mirrors
        # softmax / one-hot-ish generator outputs in TabFairGAN).
        xv = jax.random.uniform(kx, (n, d), jnp.float32, minval=0.05, maxval=1.0)
        crit = jax.random.normal(kc, (n, 1), jnp.float32)
        lamda = 0.5
        out = fair_loss_func(
            xv, crit, lamda,
            S_start_index=s_idx, Y_start_index=y_idx,
            underpriv_index=up, priv_index=pr,
            undesire_index=und, desire_index=des,
            tile_n=tile_n)
        out = jax.block_until_ready(out)
        ref = _reference(xv, crit, lamda, s_idx, y_idx, up, pr, des)
        assert jnp.allclose(out, ref, rtol=1e-5, atol=1e-6), (out, ref)

    k1, k2, k3 = jax.random.split(jax.random.PRNGKey(0), 3)
    # Case 1: single 128-lane column window, odd tile count split across the
    # two chunks (ragged last tile + one clamped fully-out-of-range step).
    run_case(k1, 230, 160, 2, 10, 0, 1, 0, 1, tile_n=48)
    # Case 2: S and Y one-hot blocks land in different 128-lane windows, so
    # two independent 128-wide column windows of x are DMA'd.
    run_case(k2, 100, 300, 5, 200, 0, 1, 0, 1, tile_n=32)
    # Case 3: narrow input (D < 128): full-width window, desire-column
    # broadcast fallback path (no lane roll).
    run_case(k3, 50, 40, 2, 10, 0, 1, 0, 1, tile_n=16)
    print("KERNEL_OK")
</pallas_src>

<mosaic_0001>
module attributes {stable_mosaic.version = 11 : i64} {
  func.func @_fair_partials_kernel(%arg0: i32, %arg1: i32, %arg2: memref<48x128xf32, #tpu.memory_space<vmem>>, %arg3: memref<8x128xf32, #tpu.memory_space<vmem>>) attributes {dimension_semantics = [#tpu.dimension_semantics<parallel>, #tpu.dimension_semantics<arbitrary>], iteration_bounds = array<i64: 2, 3>, scalar_prefetch = 0 : i64, scratch_operands = 0 : i64, tpu.core_type = #tpu.core_type<tc>, window_params = [{transform_indices = @transform_0, window_bounds = array<i64: 48, 128>}, {transform_indices = @transform_1, window_bounds = array<i64: 8, 128>}]} {
    %c0_i32 = arith.constant 0 : i32
    %0 = arith.cmpi eq, %arg1, %c0_i32 : i32
    %1 = arith.extui %0 : i1 to i32
    %c0_i32_0 = arith.constant 0 : i32
    %2 = arith.cmpi ne, %1, %c0_i32_0 : i32
    scf.if %2 {
      %cst = arith.constant 0.000000e+00 : f32
      %21 = vector.broadcast %cst : f32 to vector<8x128xf32>
      %c0_14 = arith.constant 0 : index
      %c0_15 = arith.constant 0 : index
      %22 = vector.load %arg3[%c0_14, %c0_15] : memref<8x128xf32, #tpu.memory_space<vmem>>, vector<8x128xf32>
      tpu.vector_store %arg3[%c0_14, %c0_15], %21 {strides = array<i32>} : memref<8x128xf32, #tpu.memory_space<vmem>>, vector<8x128xf32>,
    } else {
    }
    %c0 = arith.constant 0 : index
    %c0_1 = arith.constant 0 : index
    %3 = vector.load %arg2[%c0, %c0_1] : memref<48x128xf32, #tpu.memory_space<vmem>>, vector<48x128xf32>
    %c3_i32 = arith.constant 3 : i32
    %4 = arith.muli %arg0, %c3_i32 : i32
    %5 = arith.addi %4, %arg1 : i32
    %c48_i32 = arith.constant 48 : i32
    %6 = arith.muli %5, %c48_i32 : i32
    %c48_i32_2 = arith.constant 48 : i32
    %7 = arith.addi %6, %c48_i32_2 : i32
    %c230_i32 = arith.constant 230 : i32
    %8 = arith.cmpi sle, %7, %c230_i32 : i32
    %9 = arith.extui %8 : i1 to i32
    %c0_i32_3 = arith.constant 0 : i32
    %10 = arith.cmpi ne, %9, %c0_i32_3 : i32
    %11:3 = scf.if %10 -> (vector<1x128xf32>, vector<1x128xf32>, vector<1x128xf32>) {
      %cst = arith.constant dense<0.000000e+00> : vector<128xf32>
      %21 = vector.multi_reduction <add>, %3, %cst [0] : vector<48x128xf32> to vector<128xf32>
      %22 = vector.shape_cast %21 : vector<128xf32> to vector<1x128xf32>
      %c119_i32 = arith.constant 119 : i32
      %23 = tpu.dynamic_rotate %3 by %c119_i32 dim 1 : vector<48x128xf32>, i32 -> vector<48x128xf32>
      %c120_i32 = arith.constant 120 : i32
      %24 = tpu.dynamic_rotate %3 by %c120_i32 dim 1 : vector<48x128xf32>, i32 -> vector<48x128xf32>
      %25 = arith.mulf %3, %23 : vector<48x128xf32>
      %cst_14 = arith.constant dense<0.000000e+00> : vector<128xf32>
      %26 = vector.multi_reduction <add>, %25, %cst_14 [0] : vector<48x128xf32> to vector<128xf32>
      %27 = vector.shape_cast %26 : vector<128xf32> to vector<1x128xf32>
      %28 = arith.mulf %3, %24 : vector<48x128xf32>
      %cst_15 = arith.constant dense<0.000000e+00> : vector<128xf32>
      %29 = vector.multi_reduction <add>, %28, %cst_15 [0] : vector<48x128xf32> to vector<128xf32>
      %30 = vector.shape_cast %29 : vector<128xf32> to vector<1x128xf32>
      scf.yield %22, %27, %30 : vector<1x128xf32>, vector<1x128xf32>, vector<1x128xf32>
    } else {
      %21 = tpu.iota {dimensions = array<i32: 0>} : vector<48x128xi32>
      %22 = vector.broadcast %6 : i32 to vector<48x128xi32>
      %23 = arith.addi %21, %22 : vector<48x128xi32>
      %c230_i32_14 = arith.constant 230 : i32
      %24 = vector.broadcast %c230_i32_14 : i32 to vector<48x128xi32>
      %25 = arith.cmpi slt, %23, %24 : vector<48x128xi32>
      %cst = arith.constant 0.000000e+00 : f32
      %26 = vector.broadcast %cst : f32 to vector<48x128xf32>
      %27 = arith.select %25, %3, %26 : vector<48x128xi1>, vector<48x128xf32>
      %cst_15 = arith.constant dense<0.000000e+00> : vector<128xf32>
      %28 = vector.multi_reduction <add>, %27, %cst_15 [0] : vector<48x128xf32> to vector<128xf32>
      %29 = vector.shape_cast %28 : vector<128xf32> to vector<1x128xf32>
      %c119_i32 = arith.constant 119 : i32
      %30 = tpu.dynamic_rotate %27 by %c119_i32 dim 1 : vector<48x128xf32>, i32 -> vector<48x128xf32>
      %c120_i32 = arith.constant 120 : i32
      %31 = tpu.dynamic_rotate %27 by %c120_i32 dim 1 : vector<48x128xf32>, i32 -> vector<48x128xf32>
      %32 = arith.mulf %27, %30 : vector<48x128xf32>
      %cst_16 = arith.constant dense<0.000000e+00> : vector<128xf32>
      %33 = vector.multi_reduction <add>, %32, %cst_16 [0] : vector<48x128xf32> to vector<128xf32>
      %34 = vector.shape_cast %33 : vector<128xf32> to vector<1x128xf32>
      %35 = arith.mulf %27, %31 : vector<48x128xf32>
      %cst_17 = arith.constant dense<0.000000e+00> : vector<128xf32>
      %36 = vector.multi_reduction <add>, %35, %cst_17 [0] : vector<48x128xf32> to vector<128xf32>
      %37 = vector.shape_cast %36 : vector<128xf32> to vector<1x128xf32>
      scf.yield %29, %34, %37 : vector<1x128xf32>, vector<1x128xf32>, vector<1x128xf32>
    }
    %c0_4 = arith.constant 0 : index
    %c0_5 = arith.constant 0 : index
    %12 = vector.load %arg3[%c0_4, %c0_5] : memref<8x128xf32, #tpu.memory_space<vmem>>, vector<1x128xf32>
    %13 = arith.addf %12, %11#0 : vector<1x128xf32>
    %c0_6 = arith.constant 0 : index
    %c0_7 = arith.constant 0 : index
    %14 = vector.load %arg3[%c0_6, %c0_7] : memref<8x128xf32, #tpu.memory_space<vmem>>, vector<1x128xf32>
    tpu.vector_store %arg3[%c0_6, %c0_7], %13 {strides = array<i32>} : memref<8x128xf32, #tpu.memory_space<vmem>>, vector<1x128xf32>,
    %c1 = arith.constant 1 : index
    %c0_8 = arith.constant 0 : index
    %15 = vector.load %arg3[%c1, %c0_8] : memref<8x128xf32, #tpu.memory_space<vmem>>, vector<1x128xf32>
    %16 = arith.addf %15, %11#1 : vector<1x128xf32>
    %c1_9 = arith.constant 1 : index
    %c0_10 = arith.constant 0 : index
    %17 = vector.load %arg3[%c1_9, %c0_10] : memref<8x128xf32, #tpu.memory_space<vmem>>, vector<1x128xf32>
    tpu.vector_store %arg3[%c1_9, %c0_10], %16 {strides = array<i32>} : memref<8x128xf32, #tpu.memory_space<vmem>>, vector<1x128xf32>,
    %c2 = arith.constant 2 : index
    %c0_11 = arith.constant 0 : index
    %18 = vector.load %arg3[%c2, %c0_11] : memref<8x128xf32, #tpu.memory_space<vmem>>, vector<1x128xf32>
    %19 = arith.addf %18, %11#2 : vector<1x128xf32>
    %c2_12 = arith.constant 2 : index
    %c0_13 = arith.constant 0 : index
    %20 = vector.load %arg3[%c2_12, %c0_13] : memref<8x128xf32, #tpu.memory_space<vmem>>, vector<1x128xf32>
    tpu.vector_store %arg3[%c2_12, %c0_13], %19 {strides = array<i32>} : memref<8x128xf32, #tpu.memory_space<vmem>>, vector<1x128xf32>,
    return
  }
  func.func @transform_0(%arg0: i32, %arg1: i32) -> (i32, i32) {
    %c3_i32 = arith.constant 3 : i32
    %0 = arith.muli %arg0, %c3_i32 : i32
    %1 = arith.addi %0, %arg1 : i32
    %c4_i32 = arith.constant 4 : i32
    %2 = arith.minsi %1, %c4_i32 : i32
    %c0_i32 = arith.constant 0 : i32
    %c0_i32_0 = arith.constant 0 : i32
    return %2, %c0_i32 : i32, i32
  }
  func.func @transform_1(%arg0: i32, %arg1: i32) -> (i32, i32) {
    %c0_i32 = arith.constant 0 : i32
    %c0_i32_0 = arith.constant 0 : i32
    return %arg0, %c0_i32 : i32, i32
  }
}

</mosaic_0001>

<bundles_post_ra>
// kernel: tpu_custom_call.1
= control target key start
LH: loop header
LB: loop body
LE: loop exit
PB: predicated region body
PF: predicated region fallthrough
CT: control target
= control target key end

     0   :  { %s1422_s0 = inlined_call_operand.vmem [shape: f32[230,160], index: 0, kind: input, shape index: {}]   ;;  %s1423_s1 = inlined_call_operand.hbm [shape: f32[16,128], index: 1, kind: output, shape index: {}]  }
   0x1   :  { %1426 = sst [smem:[#allocation8_spill]] %s1422_s0 }
   0x2   :  { %6 = vsyncpa [#allocation4], 0 }
   0x3   :  { %8 = vsyncpa [#allocation4 + $0x1], 0  ;;  %s1096_s6 = smov 0   ;;  %s1098_s7 = smov 0  }
   0x4   :  { %s1100_s8 = smov 0   ;;  %s1102_s9 = smov 0  }
   0x5   :  { %s1104_s10 = smov 0   ;;  %s1106_s11 = smov 0  }
   0x6   :  { %s1108_s12 = smov 0   ;;  %s1110_s13 = smov 0  }
   0x7   :  { %s1112_s14 = smov 0   ;;  %s1114_s15 = smov 0  }
   0x8 LB: > { %s619_s16 = sadd.s32 4294967295, %s1022_s15   ;;  %s23_s17 = sadd.s32 1, %s1014_s13  ;;  %s1022_s15 = sphi %s1114_s15, %s14_s15   ;;  %s1018_s14 = sphi %s1112_s14, %s1446_s14   ;;  %s1014_s13 = sphi %s1110_s13, %s1445_s13   ;;  %s1010_s12 = sphi %s1108_s12, %s1444_s12   ;;  %s1006_s11 = sphi %s1106_s11, %s1443_s11   ;;  %s1002_s10 = sphi %s1104_s10, %s1442_s10   ;;  %s998_s9 = sphi %s1102_s9, %s1441_s9   ;;  %s994_s8 = sphi %s1100_s8, %s1440_s8   ;;  %s990_s7 = sphi %s1098_s7, %s1439_s7   ;;  %s986_s6 = sphi %s1096_s6, %s1438_s6  }
   0x9   : > { %s26_s18 = sadd.s32 1, %s1018_s14  ;;  %p24_p0 = scmp.ge.s32.totalorder %s23_s17, 3 }
   0xa   : > { %s30_s19 = smul.u32 3, %s1018_s14  ;;  %s620_s20 = sadd.s32 4294967294, %s1022_s15  }
   0xb   : > { %p48_p1 = scmp.ne.s32.totalorder %s1002_s10, %s998_s9  ;;  %s1448_s17 = smov (%p24_p0, %s23_s17), 0 }
   0xc   : > { %1427 = sst [smem:[#allocation6_spill]] %s1448_s17  ;;  %s1450_s18 = smov (!%p24_p0, %s26_s18), %s1018_s14 }
   0xd   : > { %s31_s21 = sadd.s32 %s1014_s13, %s30_s19  ;;  %p49_p2 = scmp.eq.s32.totalorder %s1022_s15, 0 }
   0xe   : > { %p28_p3 = scmp.ge.s32.totalorder %s1450_s18, 2  ;;  %p32_p4 = scmp.lt.s32.totalorder %s31_s21, 4 }
   0xf   : > { %p1158_p5 = por %p49_p2, %p48_p1  ;;  %s67_s23 = sadd.s32 1, %s994_s8 }
  0x10   : > { %s1452_s18 = smov (%p28_p3, %s1450_s18), 0  ;;  %s1454_s21 = smov (!%p32_p4, %s31_s21), 4 }
  0x11   : > { %1429 = sst [smem:[#allocation7_spill]] %s1452_s18  ;;  %s34_s24 = smul.u32 3, %s1452_s18 }
  0x12   : > { %s64_s25 = ssub.s32 %s1018_s14, %s1452_s18  ;;  %p77_p7 = scmp.ne.s32.totalorder %s994_s8, %s990_s7 }
  0x13   : > { %p65_p6 = scmp.eq.s32.totalorder %s64_s25, 0  ;;  %s35_s26 = sadd.s32 %s34_s24, %s1448_s17 }
  0x14   : > { %p78_p8 = scmp.eq.s32.totalorder %s619_s16, 5  ;;  %p36_p9 = scmp.lt.s32.totalorder %s35_s26, 4 }
  0x15   : > { %p83_p10 = scmp.ne.s32.totalorder %s990_s7, %s986_s6  ;;  %p84_p12 = scmp.eq.s32.totalorder %s620_s20, 5 }
  0x16   : > { %s1174_s27 = scalar_select %p65_p6, %s994_s8, %s67_s23  }
  0x17   : > { %s1456_s26 = smov (!%p36_p9, %s35_s26), 4  ;;  %p1176_p11 = por %p78_p8, %p77_p7 }
  0x18   : > { %s38_s29 = ssub.s32 %s1454_s21, %s1456_s26  ;;  %s41_s30 = sadd.s32 1, %s1002_s10 }
  0x19   : > { %p39_p13 = scmp.eq.s32.totalorder %s38_s29, 0  ;;  %p1181_p0 = por %p84_p12, %p83_p10 }
  0x1a   : > { %p622_p1 = scmp.ge.s32.totalorder %s1022_s15, 6 }
  0x1b   : > { %s1186_s3 = scalar_select %p39_p13, %s1002_s10, %s41_s30  }
  0x1c   : > { %100 = sbr.rel (%p622_p1) target bundleno = 103 (0x67), region = 16 }
  0x23   : > { %103 = sbr.rel (!%p1158_p5) target bundleno = 103 (0x67), region = 20  ;;  %s105_s4 = sand.u32 (%p1158_p5), 1, %s1002_s10  }
  0x24   : > { %s112_s5 = smul.u32 (%p1158_p5), 6, %s1454_s21  ;;  %s1432_s0 = sld [smem:[#allocation8_spill]] (%p1158_p5) }
  0x25   : > { %s645_s16 = smul.u32 (%p1158_p5), 48, %s105_s4 }
  0x26   : > { %s113_s19 = ssub.s32 (%p1158_p5), 29, %s112_s5  ;;  %s644_s20 = smul.u32 (%p1158_p5), 96, %s1454_s21 }
  0x27   : > { %p114_p2 = scmp.lt.s32.totalorder (%p1158_p5), %s113_s19, 6  ;;  %s1200_s29 = scalar_lea.vmem (%p1158_p5), [#allocation2], %s645_s16  }
  0x2a   : > { %s1195_s25 = scalar_lea.vmem %s1432_s0, %s644_s20   ;;  %s1458_s19 = smov (!%p114_p2, %s113_s19), 6 }
  0x2b   : > { %s623_s26 = sshll.u32 %s1458_s19, 7 }
  0x2c   : > { %p627_p3 = scmp.eq.s32.totalorder %s623_s26, 0 }
  0x2d   : > { %852 = sdivrem.u32 (!%p627_p3), %s1458_s19, 6 }
  0x2e   : > { %123 = sbr.rel (%p627_p3) target bundleno = 103 (0x67), region = 24 }
  0x36   : > { %s1203_s22 = spop.drf %852 }
  0x37   : > { %p628_p4 = scmp.le.s32.totalorder %s1203_s22, 0 }
  0x38   : > { %s1433_s21 = smov (!%p628_p4), %s1200_s29  ;;  %s1434_s30 = smov (!%p628_p4), %s1195_s25 }
  0x39   : > { %564 = sbr.rel (%p628_p4) target bundleno = 74 (0x4a), region = 130  ;;  %s1212_s4 = smov (!%p628_p4), 0  }
  0x3a   : > { %s1214_s5 = smov (!%p628_p4), 0  }
  0x40 LB: >> { %v197_v0 = vld [vmem:[%s1030_s30] sm:$0xff]  ;;  %v199_v1 = vld [vmem:[%s1030_s30 + $0x10] sm:$0xff]  ;;  %s209_s16 = sadd.s32 1, %s1034_s4  ;;  %s191_s5 = sadd.s32 1, %s1038_s5   ;;  %s1038_s5 = sphi %s1214_s5, %s191_s5   ;;  %s1034_s4 = sphi %s1212_s4, %s1435_s4   ;;  %s1030_s30 = sphi %s1434_s30, %s214_s30   ;;  %s1026_s21 = sphi %s1433_s21, %s215_s21  }
  0x41   : >> { %v201_v2 = vld [vmem:[%s1030_s30 + $0x20] sm:$0xff]  ;;  %198 = vst [vmem:[%s1026_s21] sm:$0xff] %v197_v0  ;;  %200 = vst [vmem:[%s1026_s21 + $0x8] sm:$0xff] %v199_v1  ;;  %v203_v3 = vld [vmem:[%s1030_s30 + $0x30] sm:$0xff]  ;;  %p210_p5 = scmp.ge.s32.totalorder %s209_s16, %s1203_s22  ;;  %p190_p6 = scmp.ge.s32.totalorder %s191_s5, %s1203_s22 }
  0x42   : >> { %202 = vst [vmem:[%s1026_s21 + $0x10] sm:$0xff] %v201_v2  ;;  %v205_v4 = vld [vmem:[%s1030_s30 + $0x40] sm:$0xff]  ;;  %v207_v5 = vld [vmem:[%s1030_s30 + $0x50] sm:$0xff]  ;;  %204 = vst [vmem:[%s1026_s21 + $0x18] sm:$0xff] %v203_v3 }
  0x43   : >> { %206 = vst [vmem:[%s1026_s21 + $0x20] sm:$0xff] %v205_v4  ;;  %208 = vst [vmem:[%s1026_s21 + $0x28] sm:$0xff] %v207_v5  ;;  %s1460_s16 = smov (%p210_p5, %s209_s16), 0  ;;  %193 = sbr.rel (!%p190_p6) target bundleno = 64 (0x40), region = 136 }
  0x44   : >> { %s212_s20 = smul.u32 96, %s1460_s16  ;;  %s1435_s4 = smov %s1460_s16 }
  0x45   : >> { %s213_s23 = smul.u32 48, %s1460_s16 }
  0x46   : >> { %s214_s30 = scalar_lea.vmem %s1195_s25, %s212_s20  }
  0x47   : >> { %s215_s21 = scalar_lea.vmem %s1200_s29, %s213_s23 [#allocation2]  }
  0x4a PF: > { %854 = sdivrem.u32 %s1458_s19, 6 }
  0x4b   : > { %s629_s24 = smul.u32 96, %s1203_s22 }
  0x4c   : > { %s630_s26 = smul.u32 48, %s1203_s22 }
  0x4d   : > { %s1236_s20 = scalar_lea.vmem %s1195_s25, %s629_s24  }
  0x4e   : > { %s222_s23 = scalar_lea.vmem %s1200_s29, %s630_s26 [#allocation2]  }
  0x53   : > { %s855_s0 = spop.drf %854 }
  0x54   : > { %p631_p7 = scmp.le.s32.totalorder %s855_s0, 0 }
  0x55   : > { %s1040_s18 = smov (!%p631_p7), %s222_s23   ;;  %s1044_s16 = smov (!%p631_p7), %s1236_s20  }
  0x56   : > { %578 = sbr.rel (%p631_p7) target bundleno = 103 (0x67), region = 141  ;;  %s1048_s5 = smov (!%p631_p7), 0  }
  0x57   : > { %s1052_s17 = smov (!%p631_p7), 0  }
  0x5d LB: >> { %v232_v6 = vld [vmem:[%s1046_s16] sm:$0xff]  ;;  %s234_s19 = sadd.s32 1, %s1050_s5  ;;  %s226_s17 = sadd.s32 1, %s1054_s17   ;;  %s1054_s17 = sphi %s1052_s17, %s226_s17   ;;  %s1050_s5 = sphi %s1048_s5, %s1049_s5   ;;  %s1046_s16 = sphi %s1044_s16, %s239_s16   ;;  %s1042_s18 = sphi %s1040_s18, %s240_s18  }
  0x5e   : >> { %233 = vst [vmem:[%s1042_s18] sm:$0xff] %v232_v6  ;;  %p235_p8 = scmp.ge.s32.totalorder %s234_s19, %s855_s0  ;;  %p225_p9 = scmp.ge.s32.totalorder %s226_s17, %s855_s0 }
  0x60   : >> { %s1462_s19 = smov (%p235_p8, %s234_s19), 0  ;;  %228 = sbr.rel (!%p225_p9) target bundleno = 93 (0x5d), region = 147 }
  0x61   : >> { %s632_s25 = sshll.u32 %s1462_s19, 4  ;;  %s633_s29 = sshll.u32 %s1462_s19, 3 }
  0x62   : >> { %s239_s16 = scalar_lea.vmem %s1236_s20, %s632_s25   ;;  %s240_s18 = scalar_lea.vmem %s222_s23, %s633_s29 [#allocation2]  }
  0x63   : >> { %s1049_s5 = smov %s1462_s19  }
  0x67 PF: > { %p634_p10 = scmp.ge.s32.totalorder %s1022_s15, 1  ;;  %p245_p12 = scmp.lt.s32.totalorder %s1022_s15, 7 }
  0x69   : > { %p246_p13 = pnand %p634_p10, %p245_p12 }
  0x6a   : > { %s252_s22 = sand.u32 (!%p246_p13), 1, %s998_s9   ;;  %s268_s21 = sand.u32 (!%p246_p13), 1, %s990_s7  }
  0x6b   : > { %249 = sbr.rel (%p246_p13) target bundleno = 462 (0x1ce), region = 72  ;;  %s635_s30 = sshll.u32 (!%p246_p13), %s268_s21, 3 }
  0x6c   : > { %s646_s18 = smul.u32 (!%p246_p13), 48, %s252_s22  ;;  %s1247_s4 = scalar_lea.vmem (!%p246_p13), [#allocation3], %s635_s30 }
  0x6d   : > { %p636_p1 = scmp.ne.s32.totalorder (!%p246_p13), %s1006_s11, 0 }
  0x6e   : > { %s254_s17 = scalar_lea.vmem (!%p246_p13), [#allocation2], %s646_s18 }
  0x72   : > { %283 = sbr.rel (%p636_p1) target bundleno = 121 (0x79), region = 80  ;;  %v1080_v7 = vmov (!%p636_p1), 0.0  }
  0x73   : > { %284 = vst [vmem:[%s1247_s4] sm:$0xff] (!%p636_p1), %v1080_v7 }
  0x79 PF: > { %v1251_v8 = vld [vmem:[%s254_s17] sm:$0xff]  ;;  %v1253_v9 = vld [vmem:[%s254_s17 + $0x8] sm:$0xff]  ;;  %v1255_v10 = vld [vmem:[%s254_s17 + $0x10] sm:$0xff]  ;;  %s291_s0 = smul.u32 3, %s1010_s12  ;;  %v1274_v14 = vmov 0   ;;  %v1276_v15 = vmov 0  }
  0x7a   : > { %v1258_v11 = vld [vmem:[%s254_s17 + $0x18] sm:$0xff]  ;;  %v1260_v12 = vld [vmem:[%s254_s17 + $0x20] sm:$0xff]  ;;  %v1262_v13 = vld [vmem:[%s254_s17 + $0x28] sm:$0xff]  ;;  %v1278_v16 = vmov 0  }
  0x7b   : > { %s1265_s9 = sadd.s32 %s1006_s11, %s291_s0 }
  0x7c   : > { %s293_s24 = smul.u32 48, %s1265_s9 }
  0x7e   : > { %s1270_s26 = sadd.s32 48, %s293_s24 }
  0x7f   : > { %p295_p2 = scmp.le.s32.totalorder %s1270_s26, 230  ;;  %p637_p3 = scmp.gt.s32.totalorder %s1270_s26, 230 }
  0x80   : > { %s1081_s20 = smov (!%p637_p3), 120   ;;  %s1082_s11 = smov (!%p637_p3), 119   ;;  %v299_v17 = vadd.f32 (!%p637_p3), %v1253_v9, %v1251_v8 }
  0x81   : > { %298 = sbr.rel (%p637_p3) target bundleno = 279 (0x117), region = 84  ;;  %322 = vrot.lane.b32.xlu1 (!%p637_p3), %v1251_v8, %s1081_s20  ;;  %310 = vrot.lane.b32.xlu0 (!%p637_p3), %v1251_v8, %s1082_s11 }
  0x82   : > { %v300_v18 = vadd.f32 (!%p637_p3), %v299_v17, %v1255_v10 }
  0x84   : > { %v301_v19 = vadd.f32 (!%p637_p3), %v300_v18, %v1258_v11 }
  0x85   : > { %324 = vrot.lane.b32.xlu1 (!%p637_p3), %v1253_v9, %s1081_s20  ;;  %312 = vrot.lane.b32.xlu0 (!%p637_p3), %v1253_v9, %s1082_s11 }
  0x86   : > { %v302_v20 = vadd.f32 (!%p637_p3), %v301_v19, %v1260_v12 }
  0x88   : > { %v303_v21 = vadd.f32 %v302_v20, %v1262_v13 }
  0x89   : > { %326 = vrot.lane.b32.xlu1 %v1255_v10, %s1081_s20  ;;  %314 = vrot.lane.b32.xlu0 %v1255_v10, %s1082_s11 }
  0x8a   : > { %v304_v22 = vrot.slane %v303_v21, 4 }
  0x8c   : > { %v305_v23 = vadd.f32 %v304_v22, %v303_v21 }
  0x8d   : > { %328 = vrot.lane.b32.xlu1 %v1258_v11, %s1081_s20  ;;  %316 = vrot.lane.b32.xlu0 %v1258_v11, %s1082_s11 }
  0x8e   : > { %v306_v24 = vrot.slane %v305_v23, 2 }
  0x90   : > { %v307_v25 = vadd.f32 %v306_v24, %v305_v23 }
  0x91   : > { %330 = vrot.lane.b32.xlu1 %v1260_v12, %s1081_s20  ;;  %318 = vrot.lane.b32.xlu0 %v1260_v12, %s1082_s11 }
  0x92   : > { %v308_v26 = vrot.slane %v307_v25, 1 }
  0x94   : > { %v309_v16 = vadd.f32 %v308_v26, %v307_v25  }
  0x95   : > { %332 = vrot.lane.b32.xlu1 %v1262_v13, %s1081_s20  ;;  %320 = vrot.lane.b32.xlu0 %v1262_v13, %s1082_s11 }
  0xf3   : > { %v323_v27 = vpop.permute.xlu1 %322  ;;  %v311_v28 = vpop.permute.xlu0 %310 }
  0xf4   : > { %v351_v37 = vmul.f32 %v323_v27, %v1251_v8  ;;  %v334_v38 = vmul.f32 %v311_v28, %v1251_v8 }
  0xf7   : > { %v325_v29 = vpop.permute.xlu1 %324  ;;  %v313_v30 = vpop.permute.xlu0 %312 }
  0xf8   : > { %v352_v33 = vmul.f32 %v325_v29, %v1253_v9  ;;  %v335_v34 = vmul.f32 %v313_v30, %v1253_v9 }
  0xfa   : > { %v357_v41 = vadd.f32 %v352_v33, %v351_v37  ;;  %v340_v42 = vadd.f32 %v335_v34, %v334_v38 }
  0xfb   : > { %v327_v31 = vpop.permute.xlu1 %326  ;;  %v315_v32 = vpop.permute.xlu0 %314 }
  0xfc   : > { %v353_v39 = vmul.f32 %v327_v31, %v1255_v10  ;;  %v336_v40 = vmul.f32 %v315_v32, %v1255_v10 }
  0xfe   : > { %v358_v47 = vadd.f32 %v357_v41, %v353_v39  ;;  %v341_v48 = vadd.f32 %v340_v42, %v336_v40 }
  0xff   : > { %v329_v35 = vpop.permute.xlu1 %328  ;;  %v317_v36 = vpop.permute.xlu0 %316 }
 0x100   : > { %v354_v43 = vmul.f32 %v329_v35, %v1258_v11  ;;  %v337_v44 = vmul.f32 %v317_v36, %v1258_v11 }
 0x102   : > { %v359_v51 = vadd.f32 %v358_v47, %v354_v43  ;;  %v342_v52 = vadd.f32 %v341_v48, %v337_v44 }
 0x103   : > { %v331_v45 = vpop.permute.xlu1 %330  ;;  %v319_v46 = vpop.permute.xlu0 %318 }
 0x104   : > { %v355_v49 = vmul.f32 %v331_v45, %v1260_v12  ;;  %v338_v50 = vmul.f32 %v319_v46, %v1260_v12 }
 0x106   : > { %v360_v55 = vadd.f32 %v359_v51, %v355_v49  ;;  %v343_v56 = vadd.f32 %v342_v52, %v338_v50 }
 0x107   : > { %v333_v53 = vpop.permute.xlu1 %332  ;;  %v321_v54 = vpop.permute.xlu0 %320 }
 0x108   : > { %v356_v57 = vmul.f32 %v333_v53, %v1262_v13  ;;  %v339_v58 = vmul.f32 %v321_v54, %v1262_v13 }
 0x10a   : > { %v361_v59 = vadd.f32 %v360_v55, %v356_v57  ;;  %v344_v60 = vadd.f32 %v343_v56, %v339_v58 }
 0x10c   : > { %v362_v61 = vrot.slane %v361_v59, 4  ;;  %v345_v62 = vrot.slane %v344_v60, 4 }
 0x10e   : > { %v363_v63 = vadd.f32 %v362_v61, %v361_v59  ;;  %v346_v0 = vadd.f32 %v345_v62, %v344_v60 }
 0x110   : > { %v364_v1 = vrot.slane %v363_v63, 2  ;;  %v347_v2 = vrot.slane %v346_v0, 2 }
 0x112   : > { %v365_v3 = vadd.f32 %v364_v1, %v363_v63  ;;  %v348_v4 = vadd.f32 %v347_v2, %v346_v0 }
 0x114   : > { %v366_v5 = vrot.slane %v365_v3, 1  ;;  %v349_v6 = vrot.slane %v348_v4, 1 }
 0x116   : > { %v367_v14 = vadd.f32 %v366_v5, %v365_v3   ;;  %v350_v15 = vadd.f32 %v349_v6, %v348_v4  }
 0x117 PF: > { %373 = sbr.rel (%p295_p2) target bundleno = 437 (0x1b5), region = 88  ;;  %v374_v7 = vlaneseq (!%p295_p2)  ;;  %v381_v17 = vstv (!%p295_p2), %s293_s24  ;;  %s1083_s23 = smov (!%p295_p2), 120   ;;  %v1066_v16 = vphi %v1278_v16, %v309_v16   ;;  %v1062_v15 = vphi %v1276_v15, %v350_v15   ;;  %v1058_v14 = vphi %v1274_v14, %v367_v14  }
 0x118   : > { %s1084_s16 = smov (!%p295_p2), 119  }
 0x119   : > { %v375_v18 = vshrl.u32 (!%p295_p2), %v374_v7, 7 }
 0x11b   : > { %v382_v19 = vadd.s32 (!%p295_p2), %v381_v17, %v375_v18  ;;  %v376_v20 = vadd.s32 (!%p295_p2), 8, %v375_v18  ;;  %v377_v21 = vadd.s32 (!%p295_p2), 16, %v375_v18  ;;  %v378_v22 = vadd.s32 (!%p295_p2), 24, %v375_v18 }
 0x11c   : > { %v379_v23 = vadd.s32 (!%p295_p2), 32, %v375_v18  ;;  %v380_v24 = vadd.s32 (!%p295_p2), 40, %v375_v18 }
 0x11d   : > { %vm388_vm0 = vcmp.lt.s32.totalorder (!%p295_p2), %v382_v19, 230  ;;  %v383_v25 = vadd.s32 (!%p295_p2), %v381_v17, %v376_v20  ;;  %v384_v26 = vadd.s32 (!%p295_p2), %v381_v17, %v377_v21  ;;  %v385_v27 = vadd.s32 (!%p295_p2), %v381_v17, %v378_v22 }
 0x11e   : > { %v394_v28 = vsel %vm388_vm0, %v1251_v8, 0.0  ;;  %v386_v14 = vadd.s32 %v381_v17, %v379_v23  ;;  %v387_v29 = vadd.s32 %v381_v17, %v380_v24 }
 0x11f   : > { %423 = vrot.lane.b32.xlu1 %v394_v28, %s1083_s23  ;;  %411 = vrot.lane.b32.xlu0 %v394_v28, %s1084_s16  ;;  %vm389_vm1 = vcmp.lt.s32.totalorder %v383_v25, 230  ;;  %vm390_vm2 = vcmp.lt.s32.totalorder %v384_v26, 230  ;;  %vm391_vm3 = vcmp.lt.s32.totalorder %v385_v27, 230 }
 0x120   : > { %v395_v15 = vsel %vm389_vm1, %v1253_v9, 0.0  ;;  %v396_v30 = vsel %vm390_vm2, %v1255_v10, 0.0  ;;  %vm392_vm4 = vcmp.lt.s32.totalorder %v386_v14, 230  ;;  %v397_v31 = vsel %vm391_vm3, %v1258_v11, 0.0 }
 0x121   : > { %v400_v16 = vadd.f32 %v395_v15, %v394_v28  ;;  %vm393_vm5 = vcmp.lt.s32.totalorder %v387_v29, 230  ;;  %v398_v33 = vsel %vm392_vm4, %v1260_v12, 0.0 }
 0x122   : > { %v399_v34 = vsel %vm393_vm5, %v1262_v13, 0.0 }
 0x123   : > { %425 = vrot.lane.b32.xlu1 %v395_v15, %s1083_s23  ;;  %413 = vrot.lane.b32.xlu0 %v395_v15, %s1084_s16  ;;  %v401_v8 = vadd.f32 %v400_v16, %v396_v30 }
 0x125   : > { %v402_v32 = vadd.f32 %v401_v8, %v397_v31 }
 0x127   : > { %427 = vrot.lane.b32.xlu1 %v396_v30, %s1083_s23  ;;  %415 = vrot.lane.b32.xlu0 %v396_v30, %s1084_s16  ;;  %v403_v9 = vadd.f32 %v402_v32, %v398_v33 }
 0x129   : > { %v404_v10 = vadd.f32 %v403_v9, %v399_v34 }
 0x12b   : > { %429 = vrot.lane.b32.xlu1 %v397_v31, %s1083_s23  ;;  %417 = vrot.lane.b32.xlu0 %v397_v31, %s1084_s16  ;;  %v405_v35 = vrot.slane %v404_v10, 4 }
 0x12d   : > { %v406_v36 = vadd.f32 %v405_v35, %v404_v10 }
 0x12f   : > { %431 = vrot.lane.b32.xlu1 %v398_v33, %s1083_s23  ;;  %419 = vrot.lane.b32.xlu0 %v398_v33, %s1084_s16  ;;  %v407_v11 = vrot.slane %v406_v36, 2 }
 0x131   : > { %v408_v12 = vadd.f32 %v407_v11, %v406_v36 }
 0x133   : > { %433 = vrot.lane.b32.xlu1 %v399_v34, %s1083_s23  ;;  %v409_v37 = vrot.slane %v408_v12, 1  ;;  %421 = vrot.lane.b32.xlu0 %v399_v34, %s1084_s16 }
 0x135   : > { %v410_v16 = vadd.f32 %v409_v37, %v408_v12  }
 0x191   : > { %v424_v13 = vpop.permute.xlu1 %423  ;;  %v412_v38 = vpop.permute.xlu0 %411 }
 0x192   : > { %v452_v47 = vmul.f32 %v424_v13, %v394_v28  ;;  %v435_v48 = vmul.f32 %v412_v38, %v394_v28 }
 0x195   : > { %v426_v39 = vpop.permute.xlu1 %425  ;;  %v414_v40 = vpop.permute.xlu0 %413 }
 0x196   : > { %v453_v43 = vmul.f32 %v426_v39, %v395_v15  ;;  %v436_v44 = vmul.f32 %v414_v40, %v395_v15 }
 0x198   : > { %v458_v51 = vadd.f32 %v453_v43, %v452_v47  ;;  %v441_v52 = vadd.f32 %v436_v44, %v435_v48 }
 0x199   : > { %v428_v41 = vpop.permute.xlu1 %427  ;;  %v416_v42 = vpop.permute.xlu0 %415 }
 0x19a   : > { %v454_v49 = vmul.f32 %v428_v41, %v396_v30  ;;  %v437_v50 = vmul.f32 %v416_v42, %v396_v30 }
 0x19c   : > { %v459_v57 = vadd.f32 %v458_v51, %v454_v49  ;;  %v442_v58 = vadd.f32 %v441_v52, %v437_v50 }
 0x19d   : > { %v430_v45 = vpop.permute.xlu1 %429  ;;  %v418_v46 = vpop.permute.xlu0 %417 }
 0x19e   : > { %v455_v53 = vmul.f32 %v430_v45, %v397_v31  ;;  %v438_v54 = vmul.f32 %v418_v46, %v397_v31 }
 0x1a0   : > { %v460_v61 = vadd.f32 %v459_v57, %v455_v53  ;;  %v443_v62 = vadd.f32 %v442_v58, %v438_v54 }
 0x1a1   : > { %v432_v55 = vpop.permute.xlu1 %431  ;;  %v420_v56 = vpop.permute.xlu0 %419 }
 0x1a2   : > { %v456_v59 = vmul.f32 %v432_v55, %v398_v33  ;;  %v439_v60 = vmul.f32 %v420_v56, %v398_v33 }
 0x1a4   : > { %v461_v1 = vadd.f32 %v460_v61, %v456_v59  ;;  %v444_v2 = vadd.f32 %v443_v62, %v439_v60 }
 0x1a5   : > { %v434_v63 = vpop.permute.xlu1 %433  ;;  %v422_v0 = vpop.permute.xlu0 %421 }
 0x1a6   : > { %v457_v3 = vmul.f32 %v434_v63, %v399_v34  ;;  %v440_v4 = vmul.f32 %v422_v0, %v399_v34 }
 0x1a8   : > { %v462_v5 = vadd.f32 %v461_v1, %v457_v3  ;;  %v445_v6 = vadd.f32 %v444_v2, %v440_v4 }
 0x1aa   : > { %v463_v7 = vrot.slane %v462_v5, 4  ;;  %v446_v17 = vrot.slane %v445_v6, 4 }
 0x1ac   : > { %v464_v18 = vadd.f32 %v463_v7, %v462_v5  ;;  %v447_v19 = vadd.f32 %v446_v17, %v445_v6 }
 0x1ae   : > { %v465_v20 = vrot.slane %v464_v18, 2  ;;  %v448_v21 = vrot.slane %v447_v19, 2 }
 0x1b0   : > { %v466_v22 = vadd.f32 %v465_v20, %v464_v18  ;;  %v449_v23 = vadd.f32 %v448_v21, %v447_v19 }
 0x1b2   : > { %v467_v24 = vrot.slane %v466_v22, 1  ;;  %v450_v25 = vrot.slane %v449_v23, 1 }
 0x1b4   : > { %v468_v14 = vadd.f32 %v467_v24, %v466_v22   ;;  %v451_v15 = vadd.f32 %v450_v25, %v449_v23  }
 0x1b5 PF: > { %v472_v26 = vld [vmem:[%s1247_s4] sm:$0x1]  ;;  %v475_v27 = vld [vmem:[%s1247_s4 + $0x1] sm:$0x1]  ;;  %v478_v28 = vld [vmem:[%s1247_s4 + $0x2] sm:$0x1]  ;;  %v1078_v16 = vphi %v1066_v16, %v410_v16   ;;  %v1074_v15 = vphi %v1062_v15, %v451_v15   ;;  %v1070_v14 = vphi %v1058_v14, %v468_v14  }
 0x1b6   : > { %v473_v29 = vadd.f32 %v1078_v16, %v472_v26  ;;  %v476_v30 = vadd.f32 %v1074_v15, %v475_v27  ;;  %v479_v8 = vadd.f32 %v1070_v14, %v478_v28  ;;  %s639_s5 = sshll.u32 %s1010_s12, 7  ;;  %s495_s22 = sshll.u32 %s1247_s4, 4  ;;  %s496_s22 = int_to_ptr.vmem [resolvable:$true] %s495_s22 }
 0x1b7   : > { %s1363_s29 = scalar_lea.hbm %s1423_s1, %s639_s5  ;;  %s482_s18 = scalar_lea.sflag [#allocation4], %s268_s21 }
 0x1b8   : > { %474 = vst [vmem:[%s1247_s4] sm:$0x1] %v473_v29  ;;  %477 = vst [vmem:[%s1247_s4 + $0x1] sm:$0x1] %v476_v30  ;;  %s856_s30 = scalar_lea.vmem %s496_s22, 128  ;;  %s1085_s17 = smov [#allocation3]  }
 0x1b9   : > { %480 = vst [vmem:[%s1247_s4 + $0x2] sm:$0x1] %v479_v8  ;;  %p857_p4 = scmp.ne.s32.totalorder %s496_s22, %s856_s30  ;;  %s860_s0 = sshll.u32 %s1085_s17, 4  ;;  %s861_s0 = int_to_ptr.vmem [resolvable:$false] %s860_s0 }
 0x1ba   : > { %s862_s12 = scalar_lea.vmem %s861_s0, 256  ;;  %p863_p7 = scmp.lt.s32.totalorder %s496_s22, %s861_s0 }
 0x1bb   : > { %p858_p5 = pnand %p857_p4, %p1176_p11  ;;  %p864_p8 = scmp.lt.s32.totalorder %s862_s12, %s856_s30 }
 0x1bd   : > { %p859_p6 = pneg %p858_p5  ;;  %p865_p9 = por %p864_p8, %p863_p7 }
 0x1bf   : > { %p866_p10 = pnand %p865_p9, %p859_p6 }
 0x1c1   : > { %869 = shalt.err (!%p866_p10)
}
 0x1c2   : > { %s870_s21 = scalar_lea.hbm %s1363_s29, 128  ;;  %s874_s24 = scalar_lea.hbm %s1423_s1, 256 }
 0x1c3   : > { %p871_p12 = scmp.ne.s32.totalorder %s1363_s29, %s870_s21  ;;  %p875_p2 = scmp.lt.u32.totalorder %s1363_s29, %s1423_s1 }
 0x1c4   : > { %p876_p3 = scmp.lt.u32.totalorder %s874_s24, %s870_s21  ;;  %p878_p5 = scmp.lt.u32.totalorder %s870_s21, %s1363_s29 }
 0x1c5   : > { %p872_p13 = pnand %p871_p12, %p1176_p11 }
 0x1c6   : > { %p877_p4 = por %p876_p3, %p875_p2 }
 0x1c7   : > { %p873_p1 = pneg %p872_p13 }
 0x1c8   : > { %p879_p6 = por %p878_p5, %p877_p4 }
 0x1ca   : > { %p880_p7 = pnand %p879_p6, %p873_p1 }
 0x1cc   : > { %883 = shalt.err (!%p880_p7)
}
 0x1cd   : > { %647 = dma.vmem_to_hbm [thread:$0]  (%p1176_p11), %s496_s22, 128, %s1363_s29, %s482_s18  }
 0x1ce PF: > { %p653_p8 = scmp.ge.s32.totalorder %s1022_s15, 2  ;;  %s507_s11 = sand.u32 1, %s986_s6  }
 0x1cf   : > { %s508_s23 = scalar_lea.sflag [#allocation4], %s507_s11 }
 0x1d0   : > { %p650_p9 = pnand %p653_p8, %p1181_p0 }
 0x1d2   : > { %981 = dma.done.wait (!%p650_p9), %s508_s23, 128  }
 0x1d3   : > { %983 = vsyncadd (!%p650_p9), %s508_s23, 4294967168  ;;  %s14_s15 = sadd.s32 1, %s1022_s15   ;;  %s1436_s28 = sld [smem:[#allocation6_spill]] }
 0x1d4   : > { %p11_p10 = scmp.ge.s32.totalorder %s14_s15, 8   ;;  %s1437_s16 = sld [smem:[#allocation7_spill]] }
 0x1d5   : > { %s1438_s6 = smov %s990_s7  ;;  %s1439_s7 = smov %s994_s8 }
 0x1d6   : > { %s1440_s8 = smov %s1174_s27  ;;  %s1441_s9 = smov %s1002_s10 }
 0x1d7   : > { %s1442_s10 = smov %s1186_s3  ;;  %s1443_s11 = smov %s1014_s13 }
 0x1d8   : > { %s1444_s12 = smov %s1018_s14  ;;  %13 = sbr.rel (!%p11_p10) target bundleno = 8 (0x8), region = 158 }
 0x1d9   : > { %s1445_s13 = smov %s1436_s28 }
 0x1da   : > { %s1446_s14 = smov %s1437_s16 }
 0x1df   :  { %513 = vsyncpa [#allocation4], 1 }
 0x1e0   :  { %515 = vsyncpa [#allocation4 + $0x1], 1 }

</bundles_post_ra>
